<compile_context>
chip_gen: v7x
topology: tpu7x:2x2x1
jax: 0.10.0
libtpu: 0.0.40
codegen_flags: <defaults>
</compile_context>

<pallas_src>
import functools

import jax
import jax.numpy as jnp
from jax.experimental import pallas as pl
from jax.experimental.pallas import tpu as pltpu

K = 3        # kernel_size
PAD = 1      # padding
STRIDE = 1   # stride
FACTOR = 2   # upscale_factor


def _fused_conv_ps_kernel(x_ref, w_ref, b_ref, alpha_ref, o_ref, *, apply_prelu, r, rC):
    """One (n, row-tile) step: 3x3 conv + bias (+ scalar PReLU) + fused PixelShuffle.

    x_ref     : (1, Ht*W, 9*Cin) bf16  -- all 9 taps im2col-folded into channels
    w_ref     : (9*Cin, Cout)    bf16  -- out-channels pre-permuted to (i, j, c) order
    b_ref     : (1, Cout)        f32   -- same permutation
    alpha_ref : (1,)             f32   SMEM (scalar PReLU slope)
    o_ref     : (1, r, Ht*W, rC) bf16  -- o[0, i, h*W+w, j*C+c] = out pixel (h*r+i, w*r+j, c)
    """
    # Single MXU matmul per tile, f32 accumulation.
    acc = jnp.dot(x_ref[0], w_ref[...], preferred_element_type=jnp.float32)   # (Ht*W, Cout)
    acc = acc + b_ref[...]
    if apply_prelu:
        a = alpha_ref[0]
        acc = jnp.where(acc >= 0.0, acc, a * acc)
    y = acc.astype(o_ref.dtype)
    # Fused PixelShuffle: thanks to the wrapper-side out-channel permutation this is just r
    # static lane slices (lane-tile aligned whenever rC % 128 == 0, e.g. Cout=256, r=2).
    for i in range(r):
        o_ref[0, i, :, :] = y[:, i * rC:(i + 1) * rC]


def _pick_row_tile(N, H, W, Cin9, Cout, vmem_budget_bytes=24 * 1024 * 1024):
    """Largest row tile Ht (divisor of H) whose pipeline buffers fit the VMEM budget.

    Prefers >= 2 h-steps when N == 1 (v7x shards parallel grid axes over 2 TensorCores and
    pipelining needs >= 2 steps) as long as the MXU M dimension (Ht*W) stays reasonably large.
    """
    def buf_bytes(ht):
        return (2 * ht * W * Cin9 * 2      # input block, bf16, double-buffered
                + 2 * ht * W * Cout * 2    # output block, bf16, double-buffered
                + 2 * Cin9 * Cout * 2      # weights, bf16, double-buffered
                + ht * W * Cout * 4)       # f32 accumulator (vregs / spill)

    divs = [d for d in range(H, 0, -1)
            if H % d == 0
            and (d == H or (d * W) % 8 == 0)          # (8, 128) block constraint on Ht*W
            and buf_bytes(d) <= vmem_budget_bytes]
    if not divs:
        return 1
    if N == 1:
        multi = [d for d in divs if H // d >= 2 and d * W >= 512]
        if not multi:
            multi = [d for d in divs if H // d >= 2 and d * W >= 128]
        if multi:
            return multi[0]
    return divs[0]


def upsample_block_forward(x_nchw, weight_oihw, bias, alpha, *, is_first_block=True):
    """Forward pass of UpSampleBlock (Conv3x3 -> PixelShuffle(2) [-> PReLU]).

    x_nchw      : (N, Cin, H, W)      float32
    weight_oihw : (Cout, Cin, 3, 3)   float32 (PyTorch Conv2d layout)
    bias        : (Cout,)             float32
    alpha       : (1,)                float32 (scalar PReLU slope, used iff is_first_block)
    returns     : (N, Cout // r^2, H*r, W*r) float32, NCHW (r = FACTOR)
    """
    N, Cin, H, W = x_nchw.shape
    Cout = weight_oihw.shape[0]
    r = FACTOR
    assert Cout % (r * r) == 0, "out_channels must be a multiple of upscale_factor**2"
    # Scalar-PReLU only: fusing PReLU before the pixel shuffle commutes ONLY for a single
    # shared slope (nn.PReLU() default).  Per-channel slopes would require shuffling first.
    assert alpha.size == 1, "fused PReLU requires the shared-scalar nn.PReLU() slope"
    C = Cout // (r * r)
    rC = r * C
    Cin9 = K * K * Cin
    Ht = _pick_row_tile(N, H, W, Cin9, Cout)

    # ---- wrapper-side prep (small, pre-upscale tensors) ------------------------------------
    # 1) im2col fold: all 9 taps of the 'same'-padded input into the channel axis, bf16.
    #    x9[n, h, w, (kh*3 + kw)*Cin + c] == x_pad[n, h + kh, w + kw, c]
    x_nhwc = jnp.transpose(x_nchw, (0, 2, 3, 1)).astype(jnp.bfloat16)
    x_pad = jnp.pad(x_nhwc, ((0, 0), (PAD, PAD), (PAD, PAD), (0, 0)))
    x9 = jnp.concatenate(
        [x_pad[:, kh:kh + H, kw:kw + W, :] for kh in range(K) for kw in range(K)], axis=-1)
    x9 = x9.reshape(N, H * W, Cin9)                      # contiguous reshape: free

    # 2) permute conv out-channels from PyTorch's (c, i, j) order to (i, j, c) so the in-kernel
    #    PixelShuffle is r static lane slices, then lay weights out as
    #    (kh*3*Cin + kw*Cin + cin, cout) matching the folded input channel order.
    w_perm = weight_oihw.reshape(C, r, r, Cin, K, K).transpose(1, 2, 0, 3, 4, 5)
    w_perm = w_perm.reshape(Cout, Cin, K, K)
    w_mat = jnp.transpose(w_perm, (2, 3, 1, 0)).reshape(Cin9, Cout).astype(jnp.bfloat16)
    b_perm = bias.reshape(C, r, r).transpose(1, 2, 0).reshape(1, Cout).astype(jnp.float32)
    alpha1 = alpha.reshape(1).astype(jnp.float32)

    kernel = functools.partial(
        _fused_conv_ps_kernel, apply_prelu=bool(is_first_block), r=r, rC=rC)

    # ---- the Pallas kernel: conv + bias (+ PReLU) + PixelShuffle, bf16 output ---------------
    out = pl.pallas_call(
        kernel,
        out_shape=jax.ShapeDtypeStruct((N, r, H * W, rC), jnp.bfloat16),
        grid=(N, H // Ht),
        in_specs=[
            pl.BlockSpec((1, Ht * W, Cin9), lambda n, h: (n, h, 0)),
            pl.BlockSpec((Cin9, Cout), lambda n, h: (0, 0)),
            pl.BlockSpec((1, Cout), lambda n, h: (0, 0)),
            pl.BlockSpec(memory_space=pltpu.SMEM),        # scalar PReLU slope
        ],
        out_specs=pl.BlockSpec((1, r, Ht * W, rC), lambda n, h: (n, 0, h, 0)),
        compiler_params=pltpu.CompilerParams(
            dimension_semantics=("parallel", "parallel"),
            vmem_limit_bytes=48 * 1024 * 1024),
    )(x9, w_mat, b_perm, alpha1)

    # ---- restore the PyTorch NCHW float32 layout: ONE fused transpose + cast ----------------
    # out[n, i, h*W + w, j*C + c]  ->  y[n, c, h*r + i, w*r + j]
    y = out.reshape(N, r, H, W, r, C)
    y = jnp.transpose(y, (0, 5, 2, 1, 3, 4)).reshape(N, C, H * r, W * r)
    return y.astype(jnp.float32)


def _reference_forward(x_nchw, weight_oihw, bias, alpha, *, is_first_block=True,
                       quantize_bf16=True):
    """Pure-JAX reference (lax.conv). quantize_bf16 mimics the kernel's bf16 MXU inputs."""
    x = x_nchw
    w = weight_oihw
    if quantize_bf16:
        x = x.astype(jnp.bfloat16).astype(jnp.float32)
        w = w.astype(jnp.bfloat16).astype(jnp.float32)
    conv = jax.lax.conv_general_dilated(
        x, w,
        window_strides=(STRIDE, STRIDE),
        padding=((PAD, PAD), (PAD, PAD)),
        dimension_numbers=("NCHW", "OIHW", "NCHW"),
    ) + bias[None, :, None, None]
    N, Cout, H, W = conv.shape
    r = FACTOR
    C = Cout // (r * r)
    y = conv.reshape(N, C, r, r, H, W)
    y = jnp.transpose(y, (0, 1, 4, 2, 5, 3)).reshape(N, C, H * r, W * r)
    if is_first_block:
        y = jnp.where(y >= 0.0, y, alpha[0] * y)
    return y


if __name__ == "__main__":
    # Small, module-consistent shapes: Cout must be a multiple of FACTOR**2.
    N, Cin, H, W = 2, 4, 16, 16
    Cout = 16  # -> 4 output channels after PixelShuffle(2)

    key = jax.random.PRNGKey(0)
    kx, kw_, kb = jax.random.split(key, 3)
    x = jax.random.normal(kx, (N, Cin, H, W), dtype=jnp.float32)
    weight = jax.random.normal(kw_, (Cout, Cin, K, K), dtype=jnp.float32) * 0.1
    bias = jax.random.normal(kb, (Cout,), dtype=jnp.float32) * 0.1
    alpha = jnp.array([0.25], dtype=jnp.float32)  # nn.PReLU() default init

    out = jax.block_until_ready(
        upsample_block_forward(x, weight, bias, alpha, is_first_block=True))

    assert out.shape == (N, Cout // (FACTOR * FACTOR), H * FACTOR, W * FACTOR)
    assert out.dtype == jnp.float32

    # tight check vs a reference using the same bf16-quantized inputs (isolates kernel bugs;
    # the extra bf16 rounding of the kernel's output is covered by the tolerance)
    ref_q = _reference_forward(x, weight, bias, alpha, is_first_block=True, quantize_bf16=True)
    assert jnp.allclose(out, ref_q, atol=2e-2, rtol=2e-2), "mismatch vs bf16-quantized reference"

    # loose sanity check vs the full-f32 reference (bf16 MXU inputs introduce ~1e-2 noise)
    ref_f = _reference_forward(x, weight, bias, alpha, is_first_block=True, quantize_bf16=False)
    assert jnp.allclose(out, ref_f, atol=1e-1, rtol=1e-1), "mismatch vs f32 reference"

    print("KERNEL_OK")
</pallas_src>

<mosaic_0001>
module attributes {stable_mosaic.version = 11 : i64} {
  func.func @_fused_conv_ps_kernel(%arg0: i32, %arg1: i32, %arg2: memref<1x256x36xbf16, #tpu.memory_space<vmem>>, %arg3: memref<36x16xbf16, #tpu.memory_space<vmem>>, %arg4: memref<1x16xf32, #tpu.memory_space<vmem>>, %arg5: memref<1xf32, #tpu.memory_space<smem>>, %arg6: memref<1x2x256x8xbf16, #tpu.memory_space<vmem>>) attributes {dimension_semantics = [#tpu.dimension_semantics<parallel>, #tpu.dimension_semantics<parallel>], iteration_bounds = array<i64: 2, 1>, scalar_prefetch = 0 : i64, scratch_operands = 0 : i64, tpu.core_type = #tpu.core_type<tc>, window_params = [{transform_indices = @transform_0, window_bounds = array<i64: 1, 256, 36>}, {pipeline_mode = #tpu.pipeline_mode<synchronous>, transform_indices = @transform_1, window_bounds = array<i64: 36, 16>}, {pipeline_mode = #tpu.pipeline_mode<synchronous>, transform_indices = @transform_2, window_bounds = array<i64: 1, 16>}, {transform_indices = @transform_3, window_bounds = array<i64: 1>}, {transform_indices = @transform_4, window_bounds = array<i64: 1, 2, 256, 8>}]} {
    %c0 = arith.constant 0 : index
    %c0_0 = arith.constant 0 : index
    %c0_1 = arith.constant 0 : index
    %0 = vector.load %arg2[%c0, %c0_0, %c0_1] : memref<1x256x36xbf16, #tpu.memory_space<vmem>>, vector<1x256x36xbf16>
    %1 = vector.shape_cast %0 : vector<1x256x36xbf16> to vector<256x36xbf16>
    %c0_2 = arith.constant 0 : index
    %c0_3 = arith.constant 0 : index
    %2 = vector.load %arg3[%c0_2, %c0_3] : memref<36x16xbf16, #tpu.memory_space<vmem>>, vector<36x16xbf16>
    %cst = arith.constant dense<0.000000e+00> : vector<256x16xf32>
    %3 = tpu.matmul %1, %2, %cst {dimension_numbers = #tpu.dot_dimension_numbers<[1], [0], [0], [1], [0, 0, 1, 1], [], []>} : vector<256x36xbf16>, vector<36x16xbf16>, vector<256x16xf32> -> vector<256x16xf32>
    %c0_4 = arith.constant 0 : index
    %c0_5 = arith.constant 0 : index
    %4 = vector.load %arg4[%c0_4, %c0_5] : memref<1x16xf32, #tpu.memory_space<vmem>>, vector<1x16xf32>
    %5 = vector.broadcast %4 : vector<1x16xf32> to vector<256x16xf32>
    %6 = arith.addf %3, %5 : vector<256x16xf32>
    %c0_6 = arith.constant 0 : index
    %7 = memref.load %arg5[%c0_6] : memref<1xf32, #tpu.memory_space<smem>>
    %cst_7 = arith.constant 0.000000e+00 : f32
    %8 = vector.broadcast %cst_7 : f32 to vector<256x16xf32>
    %9 = arith.cmpf oge, %6, %8 : vector<256x16xf32>
    %10 = vector.broadcast %7 : f32 to vector<256x16xf32>
    %11 = arith.mulf %10, %6 : vector<256x16xf32>
    %12 = arith.select %9, %6, %11 : vector<256x16xi1>, vector<256x16xf32>
    %13 = arith.truncf %12 : vector<256x16xf32> to vector<256x16xbf16>
    %14 = vector.extract_strided_slice %13 {offsets = [0, 0], sizes = [256, 8], strides = [1, 1]} : vector<256x16xbf16> to vector<256x8xbf16>
    %c0_8 = arith.constant 0 : index
    %c0_9 = arith.constant 0 : index
    %c0_10 = arith.constant 0 : index
    %c0_11 = arith.constant 0 : index
    %15 = vector.load %arg6[%c0_8, %c0_9, %c0_10, %c0_11] : memref<1x2x256x8xbf16, #tpu.memory_space<vmem>>, vector<1x1x256x8xbf16>
    %16 = vector.shape_cast %15 : vector<1x1x256x8xbf16> to vector<256x8xbf16>
    %17 = vector.shape_cast %14 : vector<256x8xbf16> to vector<1x1x256x8xbf16>
    tpu.vector_store %arg6[%c0_8, %c0_9, %c0_10, %c0_11], %17 {strides = array<i32>} : memref<1x2x256x8xbf16, #tpu.memory_space<vmem>>, vector<1x1x256x8xbf16>,
    %18 = vector.extract_strided_slice %13 {offsets = [0, 8], sizes = [256, 8], strides = [1, 1]} : vector<256x16xbf16> to vector<256x8xbf16>
    %c0_12 = arith.constant 0 : index
    %c1 = arith.constant 1 : index
    %c0_13 = arith.constant 0 : index
    %c0_14 = arith.constant 0 : index
    %19 = vector.load %arg6[%c0_12, %c1, %c0_13, %c0_14] : memref<1x2x256x8xbf16, #tpu.memory_space<vmem>>, vector<1x1x256x8xbf16>
    %20 = vector.shape_cast %19 : vector<1x1x256x8xbf16> to vector<256x8xbf16>
    %21 = vector.shape_cast %18 : vector<256x8xbf16> to vector<1x1x256x8xbf16>
    tpu.vector_store %arg6[%c0_12, %c1, %c0_13, %c0_14], %21 {strides = array<i32>} : memref<1x2x256x8xbf16, #tpu.memory_space<vmem>>, vector<1x1x256x8xbf16>,
    return
  }
  func.func @transform_0(%arg0: i32, %arg1: i32) -> (i32, i32, i32) {
    %c0_i32 = arith.constant 0 : i32
    %c0_i32_0 = arith.constant 0 : i32
    return %arg0, %arg1, %c0_i32 : i32, i32, i32
  }
  func.func @transform_1(%arg0: i32, %arg1: i32) -> (i32, i32) {
    %c0_i32 = arith.constant 0 : i32
    %c0_i32_0 = arith.constant 0 : i32
    %c0_i32_1 = arith.constant 0 : i32
    return %c0_i32, %c0_i32_0 : i32, i32
  }
  func.func @transform_2(%arg0: i32, %arg1: i32) -> (i32, i32) {
    %c0_i32 = arith.constant 0 : i32
    %c0_i32_0 = arith.constant 0 : i32
    %c0_i32_1 = arith.constant 0 : i32
    return %c0_i32, %c0_i32_0 : i32, i32
  }
  func.func @transform_3(%arg0: i32, %arg1: i32) -> i32 {
    %c0_i32 = arith.constant 0 : i32
    %c0_i32_0 = arith.constant 0 : i32
    return %c0_i32 : i32
  }
  func.func @transform_4(%arg0: i32, %arg1: i32) -> (i32, i32, i32, i32) {
    %c0_i32 = arith.constant 0 : i32
    %c0_i32_0 = arith.constant 0 : i32
    %c0_i32_1 = arith.constant 0 : i32
    return %arg0, %c0_i32, %arg1, %c0_i32_0 : i32, i32, i32, i32
  }
}

</mosaic_0001>

<bundles_post_ra>
// kernel: tpu_custom_call.1
= control target key start
LH: loop header
LB: loop body
LE: loop exit
PB: predicated region body
PF: predicated region fallthrough
CT: control target
= control target key end

     0   :  { %s1374_s17 = smov 0   ;;  %s1376_s18 = smov 0   ;;  %s1804_s0 = inlined_call_operand.vmem [shape: bf16[2,256,36], index: 0, kind: input, shape index: {}]   ;;  %s1805_s1 = inlined_call_operand.vmem [shape: bf16[36,16], index: 1, kind: input, shape index: {}]   ;;  %s1806_s2 = inlined_call_operand.vmem [shape: f32[1,16], index: 2, kind: input, shape index: {}]   ;;  %s1807_s3 = inlined_call_operand.<no memory space> [shape: f32[1], index: 3, kind: input, shape index: {}]   ;;  %s1808_s4 = inlined_call_operand.vmem [shape: bf16[2,2,256,8], index: 4, kind: output, shape index: {}]  }
   0x1   :  { %9 = sst [smem:[#allocation2]] %s1807_s3  ;;  %s1378_s19 = smov 0  }
   0x2 LB: > { %s27_s3 = sadd.s32 1, %s1339_s18  ;;  %p1071_p0 = scmp.ge.s32.totalorder %s1343_s19, 1  ;;  %s1343_s19 = sphi %s1378_s19, %s15_s19   ;;  %s1339_s18 = sphi %s1376_s18, %s1810_s18   ;;  %s1335_s17 = sphi %s1374_s17, %s1809_s17  }
   0x3   : > { %p29_p1 = scmp.ge.s32.totalorder %s27_s3, 2  ;;  %p184_p2 = scmp.lt.s32.totalorder %s1343_s19, 3 }
   0x5   : > { %s1812_s3 = smov (%p29_p1, %s27_s3), 0  ;;  %p185_p3 = pnand %p1071_p0, %p184_p2 }
   0x6   : > { %v1302_v0 = vld [vmem:[%s1805_s1] sm:$0xff] (!%p185_p3)   ;;  %v1303_v1 = vld [vmem:[%s1805_s1 + $0x8] sm:$0xff] (!%p185_p3)   ;;  %p219_p4 = scmp.lt.s32.totalorder (!%p185_p3), %s1335_s17, 1  ;;  %v1304_v2 = vld [vmem:[%s1805_s1 + $0x10] ss:$0 sps:$4 sm:$0x33] (!%p185_p3)  }
   0x7   : > { %188 = sbr.rel (%p185_p3) target bundleno = 418 (0x1a2), region = 36  ;;  %1231 = vmatprep.subr.bf16.mxu0 (!%p185_p3), %v1302_v0  ;;  %1269 = vmatprep.subr.bf16.mxu1 (!%p185_p3), %v1302_v0  ;;  %vm427_vm0 = vcmask (!%p185_p3), 1041408   ;;  %vm378_vm1 = vcmask (!%p185_p3), 293888   ;;  %s592_s30 = sld [smem:[#allocation2]] (!%p185_p3)  ;;  %v1444_v20 = vld [vmem:[%s1806_s2] ss:$0 sm:$0xff] (!%p185_p3) }
   0x8   : > { %1232 = vmatpush3.bf16.msra.mxu0 (!%p185_p3), %v1302_v0  ;;  %1272 = vmatpush3.bf16.msra.mxu1 (!%p185_p3), %v1302_v0  ;;  %v429_v4 = vsel (!%p185_p3), %vm427_vm0, %v1304_v2, 0  ;;  %vm818_vm7 = vcmask (!%p185_p3), 60416   ;;  %s1345_s11 = smov (!%p185_p3), 120  }
   0x9   : > { %1233 = vmatprep.subr.bf16.mxu0 (!%p185_p3), %v1303_v1  ;;  %1270 = vmatprep.subr.bf16.mxu1 (!%p185_p3), %v1303_v1 }
   0xc   : > { %1234 = vmatpush3.bf16.msra.mxu0 (!%p185_p3), %v1303_v1  ;;  %1273 = vmatpush3.bf16.msra.mxu1 (!%p185_p3), %v1303_v1 }
   0xd   : > { %1275 = vmatprep.subr.msk.bf16.mxu0 (!%p185_p3), %vm427_vm0, %v1304_v2  ;;  %1276 = vmatprep.subr.msk.bf16.mxu1 (!%p185_p3), %vm427_vm0, %v1304_v2  ;;  %v1446_v22 = vstv (!%p185_p3), %s592_s30 }
   0xe   : > { %s1814_s17 = smov (!%p219_p4, %s1335_s17), 1 }
   0xf   : > { %s1178_s26 = sshll.u32 %s1814_s17, 7  ;;  %s1179_s7 = sshll.u32 %s1814_s17, 8 }
  0x10   : > { %s1407_s29 = scalar_lea.vmem %s1804_s0, %s1178_s26  ;;  %1236 = vmatpush3.bf16.msra.mxu0 %v429_v4  ;;  %1274 = vmatpush3.bf16.msra.mxu1 %v429_v4  ;;  %s1464_s10 = scalar_lea.vmem %s1808_s4, %s1179_s7 }
  0x11   : > { %v1305_v3 = vld [vmem:[%s1407_s29] sm:$0xff]   ;;  %v1307_v6 = vld [vmem:[%s1407_s29 + $0x8] sm:$0xff]   ;;  %v1309_v8 = vld [vmem:[%s1407_s29 + $0x10] sm:$0xff]  }
  0x12   : > { %v1306_v5 = vld [vmem:[%s1407_s29 + $0x40] sm:$0xff]   ;;  %1237 = vmatprep.mubr.msk.bf16.mxu0 %vm378_vm1, %v1305_v3  ;;  %v1308_v7 = vld [vmem:[%s1407_s29 + $0x48] sm:$0xff]   ;;  %v1311_v9 = vld [vmem:[%s1407_s29 + $0x50] sm:$0xff]  }
  0x13   : > { %1253 = vmatprep.mubr.msk.bf16.mxu1 %vm378_vm1, %v1306_v5  ;;  %1238 = vmatmul.mubr.msk.bf16.vlgmr.msra.gmra.mrb[0].mxu0 %vm378_vm1, %v1307_v6  ;;  %v1310_v10 = vld [vmem:[%s1407_s29 + $0x18] sm:$0xff]   ;;  %v1313_v12 = vld [vmem:[%s1407_s29 + $0x20] sm:$0xff]   ;;  %v1314_v14 = vld [vmem:[%s1407_s29 + $0x28] sm:$0xff]  }
  0x14   : > { %1254 = vmatmul.mubr.msk.bf16.vlgmr.msra.gmra.mrb[0].mxu1 %vm378_vm1, %v1308_v7  ;;  %1241 = vmatprep.mubr.msk.bf16.mxu0 %vm378_vm1, %v1309_v8  ;;  %v1312_v11 = vld [vmem:[%s1407_s29 + $0x58] sm:$0xff]   ;;  %v1315_v13 = vld [vmem:[%s1407_s29 + $0x60] sm:$0xff]   ;;  %v1316_v15 = vld [vmem:[%s1407_s29 + $0x68] sm:$0xff]  }
  0x15   : > { %1257 = vmatprep.mubr.msk.bf16.mxu1 %vm378_vm1, %v1311_v9  ;;  %v1317_v16 = vld [vmem:[%s1407_s29 + $0x30] sm:$0xff]   ;;  %v1318_v18 = vld [vmem:[%s1407_s29 + $0x38] sm:$0xff]  }
  0x16   : > { %v1319_v17 = vld [vmem:[%s1407_s29 + $0x70] sm:$0xff]   ;;  %v1320_v19 = vld [vmem:[%s1407_s29 + $0x78] sm:$0xff]  }
  0x1b   : > { %1242 = vmatmul.mubr.msk.bf16.gmra.mrb[4].mxu0 %vm378_vm1, %v1310_v10 }
  0x1c   : > { %1258 = vmatmul.mubr.msk.bf16.gmra.mrb[4].mxu1 %vm378_vm1, %v1312_v11  ;;  %1245 = vmatprep.mubr.msk.bf16.mxu0 %vm378_vm1, %v1313_v12 }
  0x1d   : > { %1261 = vmatprep.mubr.msk.bf16.mxu1 %vm378_vm1, %v1315_v13 }
  0x23   : > { %1246 = vmatmul.mubr.msk.bf16.gmra.mrb[8].mxu0 %vm378_vm1, %v1314_v14 }
  0x24   : > { %1262 = vmatmul.mubr.msk.bf16.gmra.mrb[8].mxu1 %vm378_vm1, %v1316_v15  ;;  %1249 = vmatprep.mubr.msk.bf16.mxu0 %vm378_vm1, %v1317_v16 }
  0x25   : > { %1265 = vmatprep.mubr.msk.bf16.mxu1 %vm378_vm1, %v1319_v17 }
  0x2b   : > { %1250 = vmatmul.mubr.msk.bf16.gmra.mrb[12].mxu0 %vm378_vm1, %v1318_v18 }
  0x2c   : > { %1266 = vmatmul.mubr.msk.bf16.gmra.mrb[12].mxu1 %vm378_vm1, %v1320_v19 }
  0xe6   : > { %v1239_v21 = vpop.f32.mrb[0].mxu0 }
  0xe7   : > { %v1255_v23 = vpop.f32.mrb[0].mxu1  ;;  %v474_v24 = vadd.f32 %v1239_v21, %v1444_v20  ;;  %v465_v26 = vpop.f32.mrb[1].mxu0 }
  0xe8   : > { %v538_v25 = vadd.f32 %v1255_v23, %v1444_v20  ;;  %v529_v27 = vpop.f32.mrb[1].mxu1  ;;  %v466_v28 = vadd.f32 %v1444_v20, %v465_v26  ;;  %v1240_v29 = vpop.f32.mrb[2].mxu0 }
  0xe9   : > { %v1256_v30 = vpop.f32.mrb[2].mxu1  ;;  %v628_v31 = vmul.f32 %v1446_v22, %v474_v24  ;;  %v477_v33 = vadd.f32 %v1240_v29, %v1444_v20  ;;  %v468_v34 = vpop.f32.mrb[3].mxu0  ;;  %v1456_v37 = vadd.f32 %v1444_v20, %v529_v27  ;;  %vm595_vm5 = vcmp.ge.f32.partialorder %v474_v24, 0.0 }
  0xea   : > { %v644_v32 = vmul.f32 %v1446_v22, %v538_v25  ;;  %v532_v35 = vpop.f32.mrb[3].mxu1  ;;  %vm593_vm2 = vcmp.ge.f32.partialorder %v466_v28, 0.0  ;;  %v626_v36 = vmul.f32 %v1446_v22, %v466_v28  ;;  %v541_v39 = vadd.f32 %v1256_v30, %v1444_v20 }
  0xeb   : > { %vm596_vm3 = vcmp.ge.f32.partialorder %v477_v33, 0.0  ;;  %v629_v38 = vmul.f32 %v1446_v22, %v477_v33  ;;  %vm611_vm4 = vcmp.ge.f32.partialorder %v538_v25, 0.0  ;;  %v660_v41 = vsel %vm595_vm5, %v474_v24, %v628_v31 }
  0xec   : > { %v676_v40 = vsel %vm611_vm4, %v538_v25, %v644_v32  ;;  %v658_v43 = vsel %vm593_vm2, %v466_v28, %v626_v36  ;;  %vm609_vm6 = vcmp.ge.f32.partialorder %v1456_v37, 0.0  ;;  %v469_v44 = vadd.f32 %v1444_v20, %v468_v34 }
  0xed   : > { %v661_v42 = vsel %vm596_vm3, %v477_v33, %v629_v38  ;;  %v533_v45 = vadd.f32 %v1444_v20, %v532_v35  ;;  %v1198_v48 = vpack.c.bf16 %v676_v40, %v676_v40  ;;  %v1182_v49 = vpack.c.bf16 %v660_v41, %v660_v41 }
  0xee   : > { %v1243_v46 = vpop.f32.mrb[4].mxu0  ;;  %v1183_v52 = vpack.c.bf16 %v661_v42, %v661_v42  ;;  %v642_v54 = vmul.f32 %v1446_v22, %v1456_v37  ;;  %v1180_v57 = vpack.c.bf16 %v658_v43, %v658_v43  ;;  %vm612_vm8 = vcmp.ge.f32.partialorder %v541_v39, 0.0 }
  0xef   : > { %v1259_v47 = vpop.f32.mrb[4].mxu1  ;;  %v490_v50 = vadd.f32 %v1243_v46, %v1444_v20  ;;  %v481_v51 = vpop.f32.mrb[5].mxu0  ;;  %v645_v60 = vmul.f32 %v1446_v22, %v541_v39  ;;  %887 = vrot.lane.b32.xlu0 %v1198_v48, %s1345_s11  ;;  %837 = vst.msk [vmem:[%s1464_s10 + $0x48] sm:$0xf] %vm818_vm7, %v1198_v48  ;;  %855 = vrot.lane.b32.xlu1 %v1182_v49, %s1345_s11  ;;  %821 = vst.msk [vmem:[%s1464_s10 + $0x8] sm:$0xf] %vm818_vm7, %v1182_v49 }
  0xf0   : > { %v545_v53 = vpop.f32.mrb[5].mxu1  ;;  %v1473_v55 = vadd.f32 %v1444_v20, %v481_v51  ;;  %v1244_v56 = vpop.f32.mrb[6].mxu0  ;;  %v1476_v58 = vadd.f32 %v1259_v47, %v1444_v20  ;;  %822 = vst.msk [vmem:[%s1464_s10 + $0xc] sm:$0xf] %vm818_vm7, %v1183_v52  ;;  %vm594_vm9 = vcmp.ge.f32.partialorder %v469_v44, 0.0  ;;  %v627_v1 = vmul.f32 %v1446_v22, %v469_v44 }
  0xf1   : > { %v1260_v59 = vpop.f32.mrb[6].mxu1  ;;  %v493_v61 = vadd.f32 %v1244_v56, %v1444_v20  ;;  %v484_v62 = vpop.f32.mrb[7].mxu0  ;;  %vm610_vm10 = vcmp.ge.f32.partialorder %v533_v45, 0.0  ;;  %v643_v2 = vmul.f32 %v1446_v22, %v533_v45  ;;  %819 = vst.msk [vmem:[%s1464_s10] sm:$0xf] %vm818_vm7, %v1180_v57  ;;  %vm599_vm11 = vcmp.ge.f32.partialorder %v490_v50, 0.0 }
  0xf2   : > { %v557_v63 = vadd.f32 %v1260_v59, %v1444_v20  ;;  %v548_v0 = vpop.f32.mrb[7].mxu1  ;;  %v632_v3 = vmul.f32 %v1446_v22, %v490_v50  ;;  %v1495_v4 = vadd.f32 %v1444_v20, %v484_v62  ;;  %v1498_v5 = vadd.f32 %v1444_v20, %v545_v53 }
  0xf3   : > { %vm597_vm12 = vcmp.ge.f32.partialorder %v1473_v55, 0.0  ;;  %v1503_v6 = vmul.f32 %v1446_v22, %v1473_v55  ;;  %v633_v7 = vmul.f32 %v1446_v22, %v493_v61  ;;  %vm615_vm13 = vcmp.ge.f32.partialorder %v1476_v58, 0.0  ;;  %857 = vrot.lane.b32.xlu1 %v1183_v52, %s1345_s11  ;;  %851 = vrot.lane.b32.xlu0 %v1180_v57, %s1345_s11 }
  0xf4   : > { %v648_v8 = vmul.f32 %v1446_v22, %v1476_v58  ;;  %vm600_vm14 = vcmp.ge.f32.partialorder %v493_v61, 0.0  ;;  %v649_v9 = vmul.f32 %v1446_v22, %v557_v63  ;;  %v1513_v10 = vadd.f32 %v1444_v20, %v548_v0 }
  0xf5   : > { %v677_v11 = vsel %vm612_vm8, %v541_v39, %v645_v60  ;;  %v674_v13 = vsel %vm609_vm6, %v1456_v37, %v642_v54  ;;  %v675_v14 = vsel %vm610_vm10, %v533_v45, %v643_v2  ;;  %v659_v15 = vsel %vm594_vm9, %v469_v44, %v627_v1 }
  0xf6   : > { %v1199_v12 = vpack.c.bf16 %v677_v11, %v677_v11  ;;  %v1247_v16 = vpop.f32.mrb[8].mxu0  ;;  %v631_v18 = vmul.f32 %v1446_v22, %v1495_v4  ;;  %vm613_vm15 = vcmp.ge.f32.partialorder %v1498_v5, 0.0  ;;  %vm616_vm0 = vcmp.ge.f32.partialorder %v557_v63, 0.0 }
  0xf7   : > { %v1263_v17 = vpop.f32.mrb[8].mxu1  ;;  %v1196_v19 = vpack.c.bf16 %v674_v13, %v674_v13  ;;  %v1197_v21 = vpack.c.bf16 %v675_v14, %v675_v14  ;;  %v497_v23 = vpop.f32.mrb[9].mxu0  ;;  %v1181_v25 = vpack.c.bf16 %v659_v15, %v659_v15  ;;  %v665_v26 = vsel %vm600_vm14, %v493_v61, %v633_v7 }
  0xf8   : > { %v561_v24 = vpop.f32.mrb[9].mxu1  ;;  %838 = vst.msk [vmem:[%s1464_s10 + $0x4c] sm:$0xf] %vm818_vm7, %v1199_v12  ;;  %v664_v27 = vsel %vm599_vm11, %v490_v50, %v632_v3  ;;  %v1529_v28 = vadd.f32 %v1247_v16, %v1444_v20  ;;  %v1248_v29 = vpop.f32.mrb[10].mxu0  ;;  %vm598_vm1 = vcmp.ge.f32.partialorder %v1495_v4, 0.0  ;;  %889 = vrot.lane.b32.xlu1 %v1199_v12, %s1345_s11  ;;  %v1187_v31 = vpack.c.bf16 %v665_v26, %v665_v26 }
  0xf9   : > { %v1264_v30 = vpop.f32.mrb[10].mxu1  ;;  %835 = vst.msk [vmem:[%s1464_s10 + $0x40] sm:$0xf] %vm818_vm7, %v1196_v19  ;;  %883 = vrot.lane.b32.xlu0 %v1196_v19, %s1345_s11  ;;  %836 = vst.msk [vmem:[%s1464_s10 + $0x44] sm:$0xf] %vm818_vm7, %v1197_v21  ;;  %v1186_v32 = vpack.c.bf16 %v664_v27, %v664_v27  ;;  %v1539_v33 = vadd.f32 %v1444_v20, %v497_v23  ;;  %v500_v34 = vpop.f32.mrb[11].mxu0  ;;  %v646_v36 = vmul.f32 %v1446_v22, %v1498_v5 }
  0xfa   : > { %v564_v35 = vpop.f32.mrb[11].mxu1  ;;  %vm614_vm2 = vcmp.ge.f32.partialorder %v1513_v10, 0.0  ;;  %820 = vst.msk [vmem:[%s1464_s10 + $0x4] sm:$0xf] %vm818_vm7, %v1181_v25  ;;  %v509_v37 = vadd.f32 %v1248_v29, %v1444_v20  ;;  %v681_v38 = vsel %vm616_vm0, %v557_v63, %v649_v9  ;;  %v647_v39 = vmul.f32 %v1446_v22, %v1513_v10  ;;  %826 = vst.msk [vmem:[%s1464_s10 + $0x1c] sm:$0xf] %vm818_vm7, %v1187_v31 }
  0xfb   : > { %825 = vst.msk [vmem:[%s1464_s10 + $0x18] sm:$0xf] %vm818_vm7, %v1186_v32  ;;  %vm603_vm3 = vcmp.ge.f32.partialorder %v1529_v28, 0.0  ;;  %v1203_v40 = vpack.c.bf16 %v681_v38, %v681_v38  ;;  %v1556_v41 = vadd.f32 %v1444_v20, %v500_v34  ;;  %v636_v42 = vmul.f32 %v1446_v22, %v1529_v28 }
  0xfc   : > { %v1562_v43 = vmul.f32 %v1446_v22, %v1539_v33  ;;  %v680_v44 = vsel %vm615_vm13, %v1476_v58, %v648_v8  ;;  %v570_v45 = vadd.f32 %v1263_v17, %v1444_v20  ;;  %885 = vrot.lane.b32.xlu1 %v1197_v21, %s1345_s11  ;;  %vm601_vm4 = vcmp.ge.f32.partialorder %v1539_v33, 0.0 }
  0xfd   : > { %853 = vrot.lane.b32.xlu0 %v1181_v25, %s1345_s11  ;;  %vm604_vm5 = vcmp.ge.f32.partialorder %v509_v37, 0.0  ;;  %v637_v46 = vmul.f32 %v1446_v22, %v509_v37  ;;  %842 = vst.msk [vmem:[%s1464_s10 + $0x5c] sm:$0xf] %vm818_vm7, %v1203_v40  ;;  %v1202_v47 = vpack.c.bf16 %v680_v44, %v680_v44  ;;  %v1575_v48 = vadd.f32 %v1444_v20, %v561_v24 }
  0xfe   : > { %vm602_vm6 = vcmp.ge.f32.partialorder %v1556_v41, 0.0  ;;  %v635_v49 = vmul.f32 %v1446_v22, %v1556_v41  ;;  %v573_v50 = vadd.f32 %v1264_v30, %v1444_v20  ;;  %v1582_v51 = vadd.f32 %v1444_v20, %v564_v35  ;;  %v1251_v52 = vpop.f32.mrb[12].mxu0 }
  0xff   : > { %v1267_v53 = vpop.f32.mrb[12].mxu1  ;;  %841 = vst.msk [vmem:[%s1464_s10 + $0x58] sm:$0xf] %vm818_vm7, %v1202_v47  ;;  %vm619_vm8 = vcmp.ge.f32.partialorder %v570_v45, 0.0  ;;  %v652_v54 = vmul.f32 %v1446_v22, %v570_v45  ;;  %v663_v56 = vsel %vm598_vm1, %v1495_v4, %v631_v18  ;;  %v662_v57 = vsel %vm597_vm12, %v1473_v55, %v1503_v6  ;;  %v513_v58 = vpop.f32.mrb[13].mxu0 }
 0x100   : > { %v577_v59 = vpop.f32.mrb[13].mxu1  ;;  %vm617_vm9 = vcmp.ge.f32.partialorder %v1575_v48, 0.0  ;;  %v1597_v60 = vmul.f32 %v1446_v22, %v1575_v48  ;;  %vm620_vm10 = vcmp.ge.f32.partialorder %v573_v50, 0.0  ;;  %v653_v61 = vmul.f32 %v1446_v22, %v573_v50  ;;  %v1252_v63 = vpop.f32.mrb[14].mxu0  ;;  %865 = vrot.lane.b32.xlu1 %v1187_v31, %s1345_s11 }
 0x101   : > { %v1602_v62 = vmul.f32 %v1446_v22, %v1582_v51  ;;  %v1268_v0 = vpop.f32.mrb[14].mxu1  ;;  %863 = vrot.lane.b32.xlu0 %v1186_v32, %s1345_s11  ;;  %vm618_vm11 = vcmp.ge.f32.partialorder %v1582_v51, 0.0  ;;  %v1185_v55 = vpack.c.bf16 %v663_v56, %v663_v56  ;;  %v1184_v1 = vpack.c.bf16 %v662_v57, %v662_v57  ;;  %v516_v3 = vpop.f32.mrb[15].mxu0 }
 0x102   : > { %v679_v2 = vsel %vm614_vm2, %v1513_v10, %v647_v39  ;;  %v580_v4 = vpop.f32.mrb[15].mxu1  ;;  %v678_v7 = vsel %vm613_vm15, %v1498_v5, %v646_v36  ;;  %v669_v8 = vsel %vm604_vm5, %v509_v37, %v637_v46  ;;  %v668_v9 = vsel %vm603_vm3, %v1529_v28, %v636_v42 }
 0x103   : > { %v1201_v6 = vpack.c.bf16 %v679_v2, %v679_v2  ;;  %824 = vst.msk [vmem:[%s1464_s10 + $0x14] sm:$0xf] %vm818_vm7, %v1185_v55  ;;  %823 = vst.msk [vmem:[%s1464_s10 + $0x10] sm:$0xf] %vm818_vm7, %v1184_v1  ;;  %v1200_v10 = vpack.c.bf16 %v678_v7, %v678_v7  ;;  %v1621_v11 = vpack.c.bf16 %v669_v8, %v669_v8 }
 0x104   : > { %v1623_v12 = vpack.c.bf16 %v668_v9, %v668_v9  ;;  %v522_v5 = vadd.f32 %v1251_v52, %v1444_v20  ;;  %v514_v13 = vadd.f32 %v1444_v20, %v513_v58  ;;  %v525_v14 = vadd.f32 %v1252_v63, %v1444_v20  ;;  %897 = vrot.lane.b32.xlu1 %v1203_v40, %s1345_s11 }
 0x105   : > { %840 = vst.msk [vmem:[%s1464_s10 + $0x54] sm:$0xf] %vm818_vm7, %v1201_v6  ;;  %v517_v15 = vadd.f32 %v1444_v20, %v516_v3  ;;  %v685_v16 = vsel %vm620_vm10, %v573_v50, %v653_v61  ;;  %895 = vrot.lane.b32.xlu0 %v1202_v47, %s1345_s11  ;;  %839 = vst.msk [vmem:[%s1464_s10 + $0x50] sm:$0xf] %vm818_vm7, %v1200_v10  ;;  %v684_v19 = vsel %vm619_vm8, %v570_v45, %v652_v54 }
 0x106   : > { %830 = vst.msk [vmem:[%s1464_s10 + $0x2c] sm:$0xf] %vm818_vm7, %v1621_v11  ;;  %829 = vst.msk [vmem:[%s1464_s10 + $0x28] sm:$0xf] %vm818_vm7, %v1623_v12  ;;  %vm607_vm12 = vcmp.ge.f32.partialorder %v522_v5, 0.0  ;;  %v640_v17 = vmul.f32 %v1446_v22, %v522_v5  ;;  %v1643_v18 = vpack.c.bf16 %v685_v16, %v685_v16  ;;  %vm605_vm13 = vcmp.ge.f32.partialorder %v514_v13, 0.0 }
 0x107   : > { %v638_v21 = vmul.f32 %v1446_v22, %v514_v13  ;;  %vm608_vm14 = vcmp.ge.f32.partialorder %v525_v14, 0.0  ;;  %v641_v23 = vmul.f32 %v1446_v22, %v525_v14  ;;  %vm606_vm15 = vcmp.ge.f32.partialorder %v517_v15, 0.0 }
 0x108   : > { %v639_v24 = vmul.f32 %v1446_v22, %v517_v15  ;;  %846 = vst.msk [vmem:[%s1464_s10 + $0x6c] sm:$0xf] %vm818_vm7, %v1643_v18  ;;  %v1206_v25 = vpack.c.bf16 %v684_v19, %v684_v19  ;;  %v586_v26 = vadd.f32 %v1267_v53, %v1444_v20  ;;  %v667_v27 = vsel %vm602_vm6, %v1556_v41, %v635_v49 }
 0x109   : > { %v666_v28 = vsel %vm601_vm4, %v1539_v33, %v1562_v43  ;;  %v578_v29 = vadd.f32 %v1444_v20, %v577_v59  ;;  %v589_v30 = vadd.f32 %v1268_v0, %v1444_v20  ;;  %861 = vrot.lane.b32.xlu1 %v1185_v55, %s1345_s11  ;;  %859 = vrot.lane.b32.xlu0 %v1184_v1, %s1345_s11 }
 0x10a   : > { %845 = vst.msk [vmem:[%s1464_s10 + $0x68] sm:$0xf] %vm818_vm7, %v1206_v25  ;;  %vm623_vm0 = vcmp.ge.f32.partialorder %v586_v26, 0.0  ;;  %v656_v31 = vmul.f32 %v1446_v22, %v586_v26  ;;  %v1189_v32 = vpack.c.bf16 %v667_v27, %v667_v27  ;;  %v1188_v34 = vpack.c.bf16 %v666_v28, %v666_v28 }
 0x10b   : > { %vm621_vm1 = vcmp.ge.f32.partialorder %v578_v29, 0.0  ;;  %v654_v35 = vmul.f32 %v1446_v22, %v578_v29  ;;  %vm624_vm2 = vcmp.ge.f32.partialorder %v589_v30, 0.0  ;;  %v657_v33 = vmul.f32 %v1446_v22, %v589_v30 }
 0x10c   : > { %828 = vst.msk [vmem:[%s1464_s10 + $0x24] sm:$0xf] %vm818_vm7, %v1189_v32  ;;  %827 = vst.msk [vmem:[%s1464_s10 + $0x20] sm:$0xf] %vm818_vm7, %v1188_v34  ;;  %v581_v36 = vadd.f32 %v1444_v20, %v580_v4  ;;  %v683_v37 = vsel %vm618_vm11, %v1582_v51, %v1602_v62  ;;  %v682_v38 = vsel %vm617_vm9, %v1575_v48, %v1597_v60 }
 0x10d   : > { %v673_v39 = vsel %vm608_vm14, %v525_v14, %v641_v23  ;;  %v1205_v40 = vpack.c.bf16 %v683_v37, %v683_v37  ;;  %v1204_v41 = vpack.c.bf16 %v682_v38, %v682_v38  ;;  %v672_v43 = vsel %vm607_vm12, %v522_v5, %v640_v17  ;;  %893 = vrot.lane.b32.xlu1 %v1201_v6, %s1345_s11 }
 0x10e   : > { %v1195_v42 = vpack.c.bf16 %v673_v39, %v673_v39  ;;  %891 = vrot.lane.b32.xlu0 %v1200_v10, %s1345_s11  ;;  %vm622_vm3 = vcmp.ge.f32.partialorder %v581_v36, 0.0  ;;  %v655_v20 = vmul.f32 %v1446_v22, %v581_v36  ;;  %v1194_v44 = vpack.c.bf16 %v672_v43, %v672_v43 }
 0x10f   : > { %v671_v45 = vsel %vm606_vm15, %v517_v15, %v639_v24  ;;  %844 = vst.msk [vmem:[%s1464_s10 + $0x64] sm:$0xf] %vm818_vm7, %v1205_v40  ;;  %843 = vst.msk [vmem:[%s1464_s10 + $0x60] sm:$0xf] %vm818_vm7, %v1204_v41  ;;  %v670_v47 = vsel %vm605_vm13, %v514_v13, %v638_v21  ;;  %v686_v48 = vsel %vm621_vm1, %v578_v29, %v654_v35 }
 0x110   : > { %834 = vst.msk [vmem:[%s1464_s10 + $0x3c] sm:$0xf] %vm818_vm7, %v1195_v42  ;;  %v1193_v46 = vpack.c.bf16 %v671_v45, %v671_v45  ;;  %v689_v22 = vsel %vm624_vm2, %v589_v30, %v657_v33  ;;  %833 = vst.msk [vmem:[%s1464_s10 + $0x38] sm:$0xf] %vm818_vm7, %v1194_v44  ;;  %v1192_v49 = vpack.c.bf16 %v670_v47, %v670_v47 }
 0x111   : > { %v687_v50 = vsel %vm622_vm3, %v581_v36, %v655_v20  ;;  %v1208_v51 = vpack.c.bf16 %v686_v48, %v686_v48  ;;  %v1211_v52 = vpack.c.bf16 %v689_v22, %v689_v22  ;;  %v688_v54 = vsel %vm623_vm0, %v586_v26, %v656_v31  ;;  %873 = vrot.lane.b32.xlu1 %v1621_v11, %s1345_s11 }
 0x112   : > { %832 = vst.msk [vmem:[%s1464_s10 + $0x34] sm:$0xf] %vm818_vm7, %v1193_v46  ;;  %v1209_v53 = vpack.c.bf16 %v687_v50, %v687_v50  ;;  %871 = vrot.lane.b32.xlu0 %v1623_v12, %s1345_s11  ;;  %831 = vst.msk [vmem:[%s1464_s10 + $0x30] sm:$0xf] %vm818_vm7, %v1192_v49  ;;  %v1210_v56 = vpack.c.bf16 %v688_v54, %v688_v54 }
 0x113   : > { %847 = vst.msk [vmem:[%s1464_s10 + $0x70] sm:$0xf] %vm818_vm7, %v1208_v51  ;;  %850 = vst.msk [vmem:[%s1464_s10 + $0x7c] sm:$0xf] %vm818_vm7, %v1211_v52 }
 0x114   : > { %848 = vst.msk [vmem:[%s1464_s10 + $0x74] sm:$0xf] %vm818_vm7, %v1209_v53  ;;  %849 = vst.msk [vmem:[%s1464_s10 + $0x78] sm:$0xf] %vm818_vm7, %v1210_v56 }
 0x115   : > { %905 = vrot.lane.b32.xlu1 %v1643_v18, %s1345_s11 }
 0x116   : > { %903 = vrot.lane.b32.xlu0 %v1206_v25, %s1345_s11 }
 0x119   : > { %869 = vrot.lane.b32.xlu1 %v1189_v32, %s1345_s11 }
 0x11a   : > { %867 = vrot.lane.b32.xlu0 %v1188_v34, %s1345_s11 }
 0x11d   : > { %901 = vrot.lane.b32.xlu1 %v1205_v40, %s1345_s11 }
 0x11e   : > { %899 = vrot.lane.b32.xlu0 %v1204_v41, %s1345_s11 }
 0x121   : > { %881 = vrot.lane.b32.xlu1 %v1195_v42, %s1345_s11 }
 0x122   : > { %879 = vrot.lane.b32.xlu0 %v1194_v44, %s1345_s11 }
 0x125   : > { %877 = vrot.lane.b32.xlu1 %v1193_v46, %s1345_s11 }
 0x126   : > { %875 = vrot.lane.b32.xlu0 %v1192_v49, %s1345_s11 }
 0x129   : > { %909 = vrot.lane.b32.xlu1 %v1209_v53, %s1345_s11 }
 0x12a   : > { %907 = vrot.lane.b32.xlu0 %v1208_v51, %s1345_s11 }
 0x12d   : > { %913 = vrot.lane.b32.xlu1 %v1211_v52, %s1345_s11 }
 0x12e   : > { %911 = vrot.lane.b32.xlu0 %v1210_v56, %s1345_s11 }
 0x161   : > { %v888_v57 = vpop.permute.xlu0 %887  ;;  %v856_v58 = vpop.permute.xlu1 %855 }
 0x162   : > { %1162 = vst.msk [vmem:[%s1464_s10 + $0xc8] sm:$0xf] %vm818_vm7, %v888_v57  ;;  %1146 = vst.msk [vmem:[%s1464_s10 + $0x88] sm:$0xf] %vm818_vm7, %v856_v58 }
 0x165   : > { %v858_v59 = vpop.permute.xlu1 %857  ;;  %v852_v60 = vpop.permute.xlu0 %851 }
 0x166   : > { %1147 = vst.msk [vmem:[%s1464_s10 + $0x8c] sm:$0xf] %vm818_vm7, %v858_v59  ;;  %1144 = vst.msk [vmem:[%s1464_s10 + $0x80] sm:$0xf] %vm818_vm7, %v852_v60 }
 0x16a   : > { %v890_v61 = vpop.permute.xlu1 %889 }
 0x16b   : > { %v884_v62 = vpop.permute.xlu0 %883  ;;  %1163 = vst.msk [vmem:[%s1464_s10 + $0xcc] sm:$0xf] %vm818_vm7, %v890_v61 }
 0x16c   : > { %1160 = vst.msk [vmem:[%s1464_s10 + $0xc0] sm:$0xf] %vm818_vm7, %v884_v62 }
 0x16e   : > { %v886_v63 = vpop.permute.xlu1 %885 }
 0x16f   : > { %v854_v0 = vpop.permute.xlu0 %853  ;;  %1161 = vst.msk [vmem:[%s1464_s10 + $0xc4] sm:$0xf] %vm818_vm7, %v886_v63 }
 0x170   : > { %1145 = vst.msk [vmem:[%s1464_s10 + $0x84] sm:$0xf] %vm818_vm7, %v854_v0 }
 0x172   : > { %v866_v55 = vpop.permute.xlu1 %865 }
 0x173   : > { %v864_v1 = vpop.permute.xlu0 %863  ;;  %1151 = vst.msk [vmem:[%s1464_s10 + $0x9c] sm:$0xf] %vm818_vm7, %v866_v55 }
 0x174   : > { %1150 = vst.msk [vmem:[%s1464_s10 + $0x98] sm:$0xf] %vm818_vm7, %v864_v1 }
 0x176   : > { %v898_v2 = vpop.permute.xlu1 %897 }
 0x177   : > { %v896_v3 = vpop.permute.xlu0 %895  ;;  %1167 = vst.msk [vmem:[%s1464_s10 + $0xdc] sm:$0xf] %vm818_vm7, %v898_v2 }
 0x178   : > { %1166 = vst.msk [vmem:[%s1464_s10 + $0xd8] sm:$0xf] %vm818_vm7, %v896_v3 }
 0x17b   : > { %v862_v4 = vpop.permute.xlu1 %861  ;;  %v860_v6 = vpop.permute.xlu0 %859 }
 0x17c   : > { %1149 = vst.msk [vmem:[%s1464_s10 + $0x94] sm:$0xf] %vm818_vm7, %v862_v4  ;;  %1148 = vst.msk [vmem:[%s1464_s10 + $0x90] sm:$0xf] %vm818_vm7, %v860_v6 }
 0x17f   : > { %v894_v7 = vpop.permute.xlu1 %893 }
 0x180   : > { %v892_v8 = vpop.permute.xlu0 %891  ;;  %1165 = vst.msk [vmem:[%s1464_s10 + $0xd4] sm:$0xf] %vm818_vm7, %v894_v7 }
 0x181   : > { %1164 = vst.msk [vmem:[%s1464_s10 + $0xd0] sm:$0xf] %vm818_vm7, %v892_v8 }
 0x183   : > { %v874_v9 = vpop.permute.xlu1 %873 }
 0x184   : > { %v872_v10 = vpop.permute.xlu0 %871  ;;  %1155 = vst.msk [vmem:[%s1464_s10 + $0xac] sm:$0xf] %vm818_vm7, %v874_v9 }
 0x185   : > { %1154 = vst.msk [vmem:[%s1464_s10 + $0xa8] sm:$0xf] %vm818_vm7, %v872_v10 }
 0x187   : > { %v906_v11 = vpop.permute.xlu1 %905 }
 0x188   : > { %v904_v12 = vpop.permute.xlu0 %903  ;;  %1171 = vst.msk [vmem:[%s1464_s10 + $0xec] sm:$0xf] %vm818_vm7, %v906_v11 }
 0x189   : > { %1170 = vst.msk [vmem:[%s1464_s10 + $0xe8] sm:$0xf] %vm818_vm7, %v904_v12 }
 0x18b   : > { %v870_v5 = vpop.permute.xlu1 %869 }
 0x18c   : > { %v868_v13 = vpop.permute.xlu0 %867  ;;  %1153 = vst.msk [vmem:[%s1464_s10 + $0xa4] sm:$0xf] %vm818_vm7, %v870_v5 }
 0x18d   : > { %1152 = vst.msk [vmem:[%s1464_s10 + $0xa0] sm:$0xf] %vm818_vm7, %v868_v13 }
 0x18f   : > { %v902_v14 = vpop.permute.xlu1 %901 }
 0x190   : > { %v900_v15 = vpop.permute.xlu0 %899  ;;  %1169 = vst.msk [vmem:[%s1464_s10 + $0xe4] sm:$0xf] %vm818_vm7, %v902_v14 }
 0x191   : > { %1168 = vst.msk [vmem:[%s1464_s10 + $0xe0] sm:$0xf] %vm818_vm7, %v900_v15 }
 0x193   : > { %v882_v16 = vpop.permute.xlu1 %881 }
 0x194   : > { %v880_v17 = vpop.permute.xlu0 %879  ;;  %1159 = vst.msk [vmem:[%s1464_s10 + $0xbc] sm:$0xf] %vm818_vm7, %v882_v16 }
 0x195   : > { %1158 = vst.msk [vmem:[%s1464_s10 + $0xb8] sm:$0xf] %vm818_vm7, %v880_v17 }
 0x197   : > { %v878_v18 = vpop.permute.xlu1 %877 }
 0x198   : > { %v876_v19 = vpop.permute.xlu0 %875  ;;  %1157 = vst.msk [vmem:[%s1464_s10 + $0xb4] sm:$0xf] %vm818_vm7, %v878_v18 }
 0x199   : > { %1156 = vst.msk [vmem:[%s1464_s10 + $0xb0] sm:$0xf] %vm818_vm7, %v876_v19 }
 0x19b   : > { %v910_v21 = vpop.permute.xlu1 %909 }
 0x19c   : > { %v908_v23 = vpop.permute.xlu0 %907  ;;  %1173 = vst.msk [vmem:[%s1464_s10 + $0xf4] sm:$0xf] %vm818_vm7, %v910_v21 }
 0x19d   : > { %1172 = vst.msk [vmem:[%s1464_s10 + $0xf0] sm:$0xf] %vm818_vm7, %v908_v23 }
 0x19f   : > { %v914_v24 = vpop.permute.xlu1 %913 }
 0x1a0   : > { %v912_v25 = vpop.permute.xlu0 %911  ;;  %1175 = vst.msk [vmem:[%s1464_s10 + $0xfc] sm:$0xf] %vm818_vm7, %v914_v24 }
 0x1a1   : > { %1174 = vst.msk [vmem:[%s1464_s10 + $0xf8] sm:$0xf] %vm818_vm7, %v912_v25 }
 0x1a2 PF: > { %s15_s19 = sadd.s32 1, %s1343_s19   ;;  %s1809_s17 = smov %s1339_s18 }
 0x1a3   : > { %p12_p5 = scmp.ge.s32.totalorder %s15_s19, 4   ;;  %s1810_s18 = smov %s1812_s3 }
 0x1a5   :  { %14 = sbr.rel (!%p12_p5) target bundleno = 2 (0x2), region = 67 }

</bundles_post_ra>
